<compile_context>
chip_gen: v7x
topology: tpu7x:2x2x1
jax: 0.10.0
libtpu: 0.0.40
codegen_flags: <defaults>
</compile_context>

<pallas_src>
import functools

import numpy as np
import jax
import jax.numpy as jnp
from jax import lax
from jax.experimental import pallas as pl
from jax.experimental.pallas import tpu as pltpu


POS_THR = 0.3
NEG_THR = 0.1


def _frcnn_loss_kernel(cls_ref, bbox_ref, gt_ref, cls_out_ref, reg_out_ref,
                       *, pos_thr, neg_thr):
    cls_nat = cls_ref[...].astype(jnp.float32)   # (bb, P, C)  natural layout
    bbox_t = bbox_ref[...]                       # (bb, 4, P)  proposals on lanes
    gt8 = gt_ref[...]                            # (bb, G, 8)  boxes 0..3, label col 4

    bb, P, C = cls_nat.shape
    G = gt8.shape[1]

    # ---- pairwise IoU in (G, P) orientation (proposals lane-dense) ---------
    bx1 = bbox_t[:, 0:1, :]
    by1 = bbox_t[:, 1:2, :]
    bx2 = bbox_t[:, 2:3, :]
    by2 = bbox_t[:, 3:4, :]                      # (bb, 1, P)
    gx1 = gt8[:, :, 0:1]
    gy1 = gt8[:, :, 1:2]
    gx2 = gt8[:, :, 2:3]
    gy2 = gt8[:, :, 3:4]                         # (bb, G, 1)

    area_b = (bx2 - bx1) * (by2 - by1)           # (bb, 1, P)
    area_g = (gx2 - gx1) * (gy2 - gy1)           # (bb, G, 1)
    iw = jnp.maximum(jnp.minimum(bx2, gx2) - jnp.maximum(bx1, gx1), 0.0)
    ih = jnp.maximum(jnp.minimum(by2, gy2) - jnp.maximum(by1, gy1), 0.0)
    inter = iw * ih                              # (bb, G, P)
    # No epsilon (matches the reference): 0-area vs 0-area -> 0 * inf = NaN,
    # which fails both threshold compares and leaves the proposal invalid.
    iou = inter * pl.reciprocal(area_b + area_g - inter, approx=False)

    # ---- max / argmax over GT (sublane reduce), first-max tie break --------
    max_iou = jnp.max(iou, axis=1, keepdims=True)                    # (bb,1,P)
    row_ids = lax.broadcasted_iota(jnp.int32, iou.shape, 1)          # (bb,G,P)
    max_idx = jnp.min(jnp.where(iou >= max_iou, row_ids, G),
                      axis=1, keepdims=True)                         # (bb,1,P)
    onehot_f = (row_ids == max_idx).astype(jnp.float32)              # (bb,G,P)

    # ---- gather GT coords + label per proposal -----------------------------
    if G > 8:
        # Fuse all five gathers into one MXU contraction over G.
        gth = jnp.einsum('bgc,bgp->bcp', gt8, onehot_f,
                         preferred_element_type=jnp.float32)         # (bb,8,P)
        gathered_box = gth[:, 0:4, :]                                # (bb,4,P)
        gathered_lab_f = gth[:, 4:5, :]                              # (bb,1,P)
    else:
        gathered_box = None
        gathered_lab_f = jnp.sum(onehot_f * gt8[:, :, 4:5],
                                 axis=1, keepdims=True)              # (bb,1,P)
    # Float one-hot gather is exact for class ids < 2^24.
    gathered_lab = gathered_lab_f.astype(jnp.int32)                  # (bb,1,P)

    pos = max_iou >= pos_thr                     # (bb, 1, P) bool
    neg = max_iou < neg_thr

    labels = jnp.where(pos, gathered_lab, -1)
    labels = jnp.where(neg, 0, labels)           # (bb, 1, P) int32

    valid_f = (labels != -1).astype(jnp.float32)
    pos_f = pos.astype(jnp.float32)
    n_valid = jnp.sum(valid_f, axis=2, keepdims=True)                # (bb,1,1)
    n_pos = jnp.sum(pos_f, axis=2, keepdims=True)                    # (bb,1,1)

    # ---- cross-entropy in natural (P, C) layout, mean over valid -----------
    m = jnp.max(cls_nat, axis=2, keepdims=True)                       # (bb,P,1)
    lse = m + jnp.log(jnp.sum(jnp.exp(cls_nat - m), axis=2, keepdims=True))
    logsm = cls_nat - lse                                             # (bb,P,C)
    # Valid-masked class one-hot in (C, P) layout (built from the (1, P)
    # labels/valid vectors with no relayout), then contract P on the MXU:
    #   CE_sum = -sum_p valid[p] * logsm[p, labels[p]] = -trace(M_T @ logsm)
    class_ids = lax.broadcasted_iota(jnp.int32, (bb, C, P), 1)
    m_t = jnp.where(class_ids == labels, valid_f, 0.0)                # (bb,C,P)
    a = jnp.einsum('bcp,bpk->bck', m_t, logsm,
                   preferred_element_type=jnp.float32)                # (bb,C,C)
    diag = (lax.broadcasted_iota(jnp.int32, (bb, C, C), 1) ==
            lax.broadcasted_iota(jnp.int32, (bb, C, C), 2)).astype(jnp.float32)
    cls_sum = -jnp.sum(jnp.sum(a * diag, axis=2, keepdims=True),
                       axis=1, keepdims=True)                         # (bb,1,1)
    cls_out_ref[...] = cls_sum / jnp.maximum(n_valid, 1.0)  # 0 if no valid

    # ---- smooth-L1 over positives (mean over n_pos * 4), per image ---------
    if gathered_box is not None:
        d = bbox_t - gathered_box                                     # (bb,4,P)
        ad = jnp.abs(d)
        sl1 = jnp.where(ad < 1.0, 0.5 * d * d, ad - 0.5)
        reg_sum = jnp.sum(jnp.sum(sl1 * pos_f, axis=2, keepdims=True),
                          axis=1, keepdims=True)                      # (bb,1,1)
    else:
        reg_sum = jnp.zeros_like(n_pos)
        for c in range(4):
            gth_c = jnp.sum(onehot_f * gt8[:, :, c:c + 1],
                            axis=1, keepdims=True)                    # (bb,1,P)
            dc = bbox_t[:, c:c + 1, :] - gth_c
            adc = jnp.abs(dc)
            sl1c = jnp.where(adc < 1.0, 0.5 * dc * dc, adc - 0.5)
            reg_sum = reg_sum + jnp.sum(sl1c * pos_f, axis=2, keepdims=True)
    reg_out_ref[...] = reg_sum / (jnp.maximum(n_pos, 1.0) * 4.0)  # 0 if no pos


def _tpu_vmem_capacity_bytes(default=64 << 20):
    """Best-effort VMEM capacity query; defaults to the v7x (64 MiB) case."""
    try:
        info = pltpu.get_tpu_info()
    except Exception:
        return default
    for name in ("vmem_capacity_bytes", "vmem_bytes", "vmem_size_bytes"):
        v = getattr(info, name, None)
        if isinstance(v, int) and v > 0:
            return v
    return default


def _per_image_vmem_bytes(P, C, G):
    f32 = 4
    # Double-buffered input/output DMA slabs per image.
    io = 2 * 2 * f32 * (P * C + 4 * P + 8 * G + 2)
    # Live temporaries: ~8 (G,P) arrays (iou / iota / one-hot / masks),
    # ~5 (P,C) arrays (logits / exp / log-softmax), misc (1,P)/(4,P) vectors.
    tmp = f32 * (8 * G * P + 5 * P * C + 16 * P)
    return io + tmp


def _pick_block_batch(B, P, C, G, vmem_cap_bytes):
    budget = int(vmem_cap_bytes * 0.6)           # headroom for compiler scratch
    per_img = max(1, _per_image_vmem_bytes(P, C, G))
    bb_max = max(1, budget // per_img)
    divisors = [d for d in range(1, B + 1) if B % d == 0 and d <= bb_max]
    if not divisors:
        divisors = [1]
    # 64-MiB-VMEM parts (v7x) have two TensorCores: prefer an even number of
    # grid steps so the "parallel" batch axis splits evenly across both TCs.
    if vmem_cap_bytes <= (64 << 20):
        even = [d for d in divisors if (B // d) >= 2 and (B // d) % 2 == 0]
        if even:
            return max(even)
    # Single-TC parts (v5e/v6e): fewest, largest steps (only grid overhead).
    return max(divisors)


def faster_rcnn_loss(frcnn_cls, frcnn_bbox, gt_boxes, gt_labels,
                     positive_iou_threshold=POS_THR,
                     negative_iou_threshold=NEG_THR,
                     block_batch=None):
    """frcnn_cls (B,P,C), frcnn_bbox (B,P,4), gt_boxes (B,G,4), gt_labels (B,G)."""
    B, P, C = frcnn_cls.shape
    G = gt_boxes.shape[1]

    vmem_cap = _tpu_vmem_capacity_bytes()
    bb = block_batch if block_batch is not None else _pick_block_batch(
        B, P, C, G, vmem_cap)
    assert B % bb == 0, "block_batch must divide the batch size"
    nblk = B // bb

    # frcnn_cls stays in natural (B, P, C) layout and original dtype: no
    # HBM relayout pass over the largest tensor (cast happens after the DMA).
    # The bbox transpose is 4 rows per image -> negligible.
    bbox_t = jnp.transpose(frcnn_bbox, (0, 2, 1)).astype(jnp.float32)  # (B,4,P)
    # Merge GT boxes + labels into one (B, G, 8) f32 slab: one DMA per step.
    gt8 = jnp.concatenate(
        [gt_boxes.astype(jnp.float32),
         gt_labels.astype(jnp.float32)[..., None],
         jnp.zeros((B, G, 3), jnp.float32)], axis=-1)                  # (B,G,8)

    kernel = functools.partial(_frcnn_loss_kernel,
                               pos_thr=float(positive_iou_threshold),
                               neg_thr=float(negative_iou_threshold))

    vmem_limit = int(max(min(vmem_cap * 3 // 4, 100 << 20), 32 << 20))

    cls_p, reg_p = pl.pallas_call(
        kernel,
        out_shape=(jax.ShapeDtypeStruct((B, 1, 1), jnp.float32),
                   jax.ShapeDtypeStruct((B, 1, 1), jnp.float32)),
        grid_spec=pltpu.PrefetchScalarGridSpec(
            num_scalar_prefetch=0,
            grid=(nblk,),
            in_specs=[
                pl.BlockSpec((bb, P, C), lambda i: (i, 0, 0)),
                pl.BlockSpec((bb, 4, P), lambda i: (i, 0, 0)),
                pl.BlockSpec((bb, G, 8), lambda i: (i, 0, 0)),
            ],
            out_specs=[
                pl.BlockSpec((bb, 1, 1), lambda i: (i, 0, 0)),
                pl.BlockSpec((bb, 1, 1), lambda i: (i, 0, 0)),
            ]),
        # No cross-step state => batch axis is truly parallel (megacore-ready).
        compiler_params=pltpu.CompilerParams(
            dimension_semantics=("parallel",),
            vmem_limit_bytes=vmem_limit),
    )(frcnn_cls, bbox_t, gt8)

    cls_loss = jnp.sum(cls_p)
    reg_loss = jnp.sum(reg_p)
    total = cls_loss + reg_loss
    return total, reg_loss, cls_loss


def _ref_loss_np(cls, bbox, gtb, gtl, pos_thr, neg_thr):
    """Pure NumPy reference reproducing the PyTorch module semantics."""
    cls = np.asarray(cls, np.float64)
    bbox = np.asarray(bbox, np.float64)
    gtb = np.asarray(gtb, np.float64)
    gtl = np.asarray(gtl)
    B, P, _ = cls.shape
    cls_total, reg_total = 0.0, 0.0
    for i in range(B):
        b, g = bbox[i], gtb[i]
        ix1 = np.maximum(b[:, None, 0], g[None, :, 0])
        iy1 = np.maximum(b[:, None, 1], g[None, :, 1])
        ix2 = np.minimum(b[:, None, 2], g[None, :, 2])
        iy2 = np.minimum(b[:, None, 3], g[None, :, 3])
        inter = np.maximum(ix2 - ix1, 0.0) * np.maximum(iy2 - iy1, 0.0)
        area_b = (b[:, 2] - b[:, 0]) * (b[:, 3] - b[:, 1])
        area_g = (g[:, 2] - g[:, 0]) * (g[:, 3] - g[:, 1])
        iou = inter / (area_b[:, None] + area_g[None, :] - inter)
        max_iou = iou.max(axis=1)
        max_idx = iou.argmax(axis=1)
        pos = np.where(max_iou >= pos_thr)[0]
        neg = np.where(max_iou < neg_thr)[0]
        labels = np.full((P,), -1, np.int64)
        labels[pos] = gtl[i][max_idx[pos]]
        labels[neg] = 0
        valid = labels != -1
        if valid.sum() > 0:
            logits = cls[i][valid]
            mx = logits.max(axis=1, keepdims=True)
            lse = (np.log(np.exp(logits - mx).sum(axis=1, keepdims=True)) + mx)[:, 0]
            ce = lse - logits[np.arange(int(valid.sum())), labels[valid]]
            cls_total += float(ce.mean())
        if pos.size > 0:
            d = b[pos] - g[max_idx[pos]]
            ad = np.abs(d)
            sl1 = np.where(ad < 1.0, 0.5 * d * d, ad - 0.5)
            reg_total += float(sl1.mean())
    return cls_total + reg_total, reg_total, cls_total


if __name__ == "__main__":
    B, P, C, G = 2, 16, 8, 4

    key = jax.random.PRNGKey(0)
    k0, k1, k2, k3, k4, k5 = jax.random.split(key, 6)

    frcnn_cls = jax.random.normal(k0, (B, P, C), dtype=jnp.float32)

    xy = jax.random.uniform(k1, (B, P, 2), dtype=jnp.float32) * 8.0
    wh = jax.random.uniform(k2, (B, P, 2), dtype=jnp.float32) * 5.0 + 1.0
    frcnn_bbox = jnp.concatenate([xy, xy + wh], axis=-1)          # (B, P, 4)

    gxy = jax.random.uniform(k3, (B, G, 2), dtype=jnp.float32) * 8.0
    gwh = jax.random.uniform(k4, (B, G, 2), dtype=jnp.float32) * 5.0 + 1.0
    gt_boxes = jnp.concatenate([gxy, gxy + gwh], axis=-1)         # (B, G, 4)
    gt_labels = jax.random.randint(k5, (B, G), 1, C)              # (B, G)

    tot, reg, clsl = faster_rcnn_loss(frcnn_cls, frcnn_bbox, gt_boxes, gt_labels,
                                      POS_THR, NEG_THR)
    jax.block_until_ready((tot, reg, clsl))

    ref_tot, ref_reg, ref_cls = _ref_loss_np(frcnn_cls, frcnn_bbox, gt_boxes,
                                             gt_labels, POS_THR, NEG_THR)

    np.testing.assert_allclose(float(tot), ref_tot, rtol=1e-4, atol=1e-5)
    np.testing.assert_allclose(float(reg), ref_reg, rtol=1e-4, atol=1e-5)
    np.testing.assert_allclose(float(clsl), ref_cls, rtol=1e-4, atol=1e-5)

    print("KERNEL_OK")
</pallas_src>

<mosaic_0001>
module attributes {stable_mosaic.version = 11 : i64} {
  func.func @_frcnn_loss_kernel(%arg0: i32, %arg1: memref<1x16x8xf32, #tpu.memory_space<vmem>>, %arg2: memref<1x4x16xf32, #tpu.memory_space<vmem>>, %arg3: memref<1x4x8xf32, #tpu.memory_space<vmem>>, %arg4: memref<1x1x1xf32, #tpu.memory_space<vmem>>, %arg5: memref<1x1x1xf32, #tpu.memory_space<vmem>>) attributes {dimension_semantics = [#tpu.dimension_semantics<parallel>], iteration_bounds = array<i64: 2>, scalar_prefetch = 0 : i64, scratch_operands = 0 : i64, tpu.core_type = #tpu.core_type<tc>, window_params = [{transform_indices = @transform_0, window_bounds = array<i64: 1, 16, 8>}, {transform_indices = @transform_1, window_bounds = array<i64: 1, 4, 16>}, {transform_indices = @transform_2, window_bounds = array<i64: 1, 4, 8>}, {transform_indices = @transform_3, window_bounds = array<i64: 1, 1, 1>}, {transform_indices = @transform_4, window_bounds = array<i64: 1, 1, 1>}]} {
    %c0 = arith.constant 0 : index
    %c0_0 = arith.constant 0 : index
    %c0_1 = arith.constant 0 : index
    %0 = vector.load %arg1[%c0, %c0_0, %c0_1] : memref<1x16x8xf32, #tpu.memory_space<vmem>>, vector<1x16x8xf32>
    %c0_2 = arith.constant 0 : index
    %c0_3 = arith.constant 0 : index
    %c0_4 = arith.constant 0 : index
    %1 = vector.load %arg2[%c0_2, %c0_3, %c0_4] : memref<1x4x16xf32, #tpu.memory_space<vmem>>, vector<1x4x16xf32>
    %c0_5 = arith.constant 0 : index
    %c0_6 = arith.constant 0 : index
    %c0_7 = arith.constant 0 : index
    %2 = vector.load %arg3[%c0_5, %c0_6, %c0_7] : memref<1x4x8xf32, #tpu.memory_space<vmem>>, vector<1x4x8xf32>
    %3 = vector.extract_strided_slice %1 {offsets = [0, 0, 0], sizes = [1, 1, 16], strides = [1, 1, 1]} : vector<1x4x16xf32> to vector<1x1x16xf32>
    %4 = vector.extract_strided_slice %1 {offsets = [0, 1, 0], sizes = [1, 1, 16], strides = [1, 1, 1]} : vector<1x4x16xf32> to vector<1x1x16xf32>
    %5 = vector.extract_strided_slice %1 {offsets = [0, 2, 0], sizes = [1, 1, 16], strides = [1, 1, 1]} : vector<1x4x16xf32> to vector<1x1x16xf32>
    %6 = vector.extract_strided_slice %1 {offsets = [0, 3, 0], sizes = [1, 1, 16], strides = [1, 1, 1]} : vector<1x4x16xf32> to vector<1x1x16xf32>
    %7 = vector.extract_strided_slice %2 {offsets = [0, 0, 0], sizes = [1, 4, 1], strides = [1, 1, 1]} : vector<1x4x8xf32> to vector<1x4x1xf32>
    %8 = vector.extract_strided_slice %2 {offsets = [0, 0, 1], sizes = [1, 4, 1], strides = [1, 1, 1]} : vector<1x4x8xf32> to vector<1x4x1xf32>
    %9 = vector.extract_strided_slice %2 {offsets = [0, 0, 2], sizes = [1, 4, 1], strides = [1, 1, 1]} : vector<1x4x8xf32> to vector<1x4x1xf32>
    %10 = vector.extract_strided_slice %2 {offsets = [0, 0, 3], sizes = [1, 4, 1], strides = [1, 1, 1]} : vector<1x4x8xf32> to vector<1x4x1xf32>
    %11 = arith.subf %5, %3 : vector<1x1x16xf32>
    %12 = arith.subf %6, %4 : vector<1x1x16xf32>
    %13 = arith.mulf %11, %12 : vector<1x1x16xf32>
    %14 = arith.subf %9, %7 : vector<1x4x1xf32>
    %15 = arith.subf %10, %8 : vector<1x4x1xf32>
    %16 = arith.mulf %14, %15 : vector<1x4x1xf32>
    %17 = vector.broadcast %5 : vector<1x1x16xf32> to vector<1x4x16xf32>
    %18 = vector.broadcast %9 : vector<1x4x1xf32> to vector<1x4x16xf32>
    %19 = arith.minimumf %17, %18 : vector<1x4x16xf32>
    %20 = vector.broadcast %3 : vector<1x1x16xf32> to vector<1x4x16xf32>
    %21 = vector.broadcast %7 : vector<1x4x1xf32> to vector<1x4x16xf32>
    %22 = arith.maximumf %20, %21 : vector<1x4x16xf32>
    %23 = arith.subf %19, %22 : vector<1x4x16xf32>
    %cst = arith.constant 0.000000e+00 : f32
    %24 = vector.broadcast %cst : f32 to vector<1x4x16xf32>
    %25 = arith.maximumf %23, %24 : vector<1x4x16xf32>
    %26 = vector.broadcast %6 : vector<1x1x16xf32> to vector<1x4x16xf32>
    %27 = vector.broadcast %10 : vector<1x4x1xf32> to vector<1x4x16xf32>
    %28 = arith.minimumf %26, %27 : vector<1x4x16xf32>
    %29 = vector.broadcast %4 : vector<1x1x16xf32> to vector<1x4x16xf32>
    %30 = vector.broadcast %8 : vector<1x4x1xf32> to vector<1x4x16xf32>
    %31 = arith.maximumf %29, %30 : vector<1x4x16xf32>
    %32 = arith.subf %28, %31 : vector<1x4x16xf32>
    %cst_8 = arith.constant 0.000000e+00 : f32
    %33 = vector.broadcast %cst_8 : f32 to vector<1x4x16xf32>
    %34 = arith.maximumf %32, %33 : vector<1x4x16xf32>
    %35 = arith.mulf %25, %34 : vector<1x4x16xf32>
    %36 = vector.broadcast %13 : vector<1x1x16xf32> to vector<1x4x16xf32>
    %37 = vector.broadcast %16 : vector<1x4x1xf32> to vector<1x4x16xf32>
    %38 = arith.addf %36, %37 : vector<1x4x16xf32>
    %39 = arith.subf %38, %35 : vector<1x4x16xf32>
    %40 = tpu.reciprocal %39 : vector<1x4x16xf32> -> vector<1x4x16xf32>
    %41 = arith.mulf %35, %40 : vector<1x4x16xf32>
    %cst_9 = arith.constant dense<0xFF800000> : vector<1x16xf32>
    %42 = vector.multi_reduction <maximumf>, %41, %cst_9 [1] : vector<1x4x16xf32> to vector<1x16xf32>
    %43 = vector.shape_cast %42 : vector<1x16xf32> to vector<1x1x16xf32>
    %44 = tpu.iota {dimensions = array<i32: 1>} : vector<1x4x16xi32>
    %45 = vector.broadcast %43 : vector<1x1x16xf32> to vector<1x4x16xf32>
    %46 = arith.cmpf oge, %41, %45 : vector<1x4x16xf32>
    %c4_i32 = arith.constant 4 : i32
    %47 = vector.broadcast %c4_i32 : i32 to vector<1x4x16xi32>
    %48 = arith.select %46, %44, %47 : vector<1x4x16xi1>, vector<1x4x16xi32>
    %cst_10 = arith.constant dense<2147483647> : vector<1x16xi32>
    %49 = vector.multi_reduction <minsi>, %48, %cst_10 [1] : vector<1x4x16xi32> to vector<1x16xi32>
    %50 = vector.shape_cast %49 : vector<1x16xi32> to vector<1x1x16xi32>
    %51 = vector.broadcast %50 : vector<1x1x16xi32> to vector<1x4x16xi32>
    %52 = arith.cmpi eq, %44, %51 : vector<1x4x16xi32>
    %53 = arith.extui %52 : vector<1x4x16xi1> to vector<1x4x16xi32>
    %54 = arith.sitofp %53 : vector<1x4x16xi32> to vector<1x4x16xf32>
    %55 = vector.extract_strided_slice %2 {offsets = [0, 0, 4], sizes = [1, 4, 1], strides = [1, 1, 1]} : vector<1x4x8xf32> to vector<1x4x1xf32>
    %56 = vector.broadcast %55 : vector<1x4x1xf32> to vector<1x4x16xf32>
    %57 = arith.mulf %54, %56 : vector<1x4x16xf32>
    %cst_11 = arith.constant dense<0.000000e+00> : vector<1x16xf32>
    %58 = vector.multi_reduction <add>, %57, %cst_11 [1] : vector<1x4x16xf32> to vector<1x16xf32>
    %59 = vector.shape_cast %58 : vector<1x16xf32> to vector<1x1x16xf32>
    %60 = arith.fptosi %59 : vector<1x1x16xf32> to vector<1x1x16xi32>
    %cst_12 = arith.constant 3.000000e-01 : f32
    %61 = vector.broadcast %cst_12 : f32 to vector<1x1x16xf32>
    %62 = arith.cmpf oge, %43, %61 : vector<1x1x16xf32>
    %cst_13 = arith.constant 1.000000e-01 : f32
    %63 = vector.broadcast %cst_13 : f32 to vector<1x1x16xf32>
    %64 = arith.cmpf olt, %43, %63 : vector<1x1x16xf32>
    %c-1_i32 = arith.constant -1 : i32
    %65 = vector.broadcast %c-1_i32 : i32 to vector<1x1x16xi32>
    %66 = arith.select %62, %60, %65 : vector<1x1x16xi1>, vector<1x1x16xi32>
    %c0_i32 = arith.constant 0 : i32
    %67 = vector.broadcast %c0_i32 : i32 to vector<1x1x16xi32>
    %68 = arith.select %64, %67, %66 : vector<1x1x16xi1>, vector<1x1x16xi32>
    %c-1_i32_14 = arith.constant -1 : i32
    %69 = vector.broadcast %c-1_i32_14 : i32 to vector<1x1x16xi32>
    %70 = arith.cmpi ne, %68, %69 : vector<1x1x16xi32>
    %71 = arith.extui %70 : vector<1x1x16xi1> to vector<1x1x16xi32>
    %72 = arith.sitofp %71 : vector<1x1x16xi32> to vector<1x1x16xf32>
    %73 = arith.extui %62 : vector<1x1x16xi1> to vector<1x1x16xi32>
    %74 = arith.sitofp %73 : vector<1x1x16xi32> to vector<1x1x16xf32>
    %cst_15 = arith.constant dense<0.000000e+00> : vector<1x1xf32>
    %75 = vector.multi_reduction <add>, %72, %cst_15 [2] : vector<1x1x16xf32> to vector<1x1xf32>
    %76 = vector.shape_cast %75 : vector<1x1xf32> to vector<1x1x1xf32>
    %cst_16 = arith.constant dense<0.000000e+00> : vector<1x1xf32>
    %77 = vector.multi_reduction <add>, %74, %cst_16 [2] : vector<1x1x16xf32> to vector<1x1xf32>
    %78 = vector.shape_cast %77 : vector<1x1xf32> to vector<1x1x1xf32>
    %cst_17 = arith.constant dense<0xFF800000> : vector<1x16xf32>
    %79 = vector.multi_reduction <maximumf>, %0, %cst_17 [2] : vector<1x16x8xf32> to vector<1x16xf32>
    %80 = vector.shape_cast %79 : vector<1x16xf32> to vector<1x16x1xf32>
    %81 = vector.broadcast %80 : vector<1x16x1xf32> to vector<1x16x8xf32>
    %82 = arith.subf %0, %81 : vector<1x16x8xf32>
    %83 = math.exp %82 : vector<1x16x8xf32>
    %cst_18 = arith.constant dense<0.000000e+00> : vector<1x16xf32>
    %84 = vector.multi_reduction <add>, %83, %cst_18 [2] : vector<1x16x8xf32> to vector<1x16xf32>
    %85 = vector.shape_cast %84 : vector<1x16xf32> to vector<1x16x1xf32>
    %86 = math.log %85 : vector<1x16x1xf32>
    %87 = arith.addf %80, %86 : vector<1x16x1xf32>
    %88 = vector.broadcast %87 : vector<1x16x1xf32> to vector<1x16x8xf32>
    %89 = arith.subf %0, %88 : vector<1x16x8xf32>
    %90 = tpu.iota {dimensions = array<i32: 1>} : vector<1x8x16xi32>
    %91 = vector.broadcast %68 : vector<1x1x16xi32> to vector<1x8x16xi32>
    %92 = arith.cmpi eq, %90, %91 : vector<1x8x16xi32>
    %cst_19 = arith.constant 0.000000e+00 : f32
    %93 = vector.shape_cast %72 : vector<1x1x16xf32> to vector<1x1x16xf32>
    %94 = vector.broadcast %93 : vector<1x1x16xf32> to vector<1x8x16xf32>
    %95 = vector.broadcast %cst_19 : f32 to vector<1x8x16xf32>
    %96 = arith.select %92, %94, %95 : vector<1x8x16xi1>, vector<1x8x16xf32>
    "tpu.trace_start"() <{level = 10 : i32, message = "bcp,bpk->bck"}> : () -> ()
    %cst_20 = arith.constant dense<0.000000e+00> : vector<1x8x8xf32>
    %97 = tpu.matmul %96, %89, %cst_20 {dimension_numbers = #tpu.dot_dimension_numbers<[2], [1], [1], [2], [0, 0, 0, 1, 1, 2], [0], [0]>} : vector<1x8x16xf32>, vector<1x16x8xf32>, vector<1x8x8xf32> -> vector<1x8x8xf32>
    "tpu.trace_stop"() : () -> ()
    %98 = tpu.iota {dimensions = array<i32: 1>} : vector<1x8x8xi32>
    %99 = tpu.iota {dimensions = array<i32: 2>} : vector<1x8x8xi32>
    %100 = arith.cmpi eq, %98, %99 : vector<1x8x8xi32>
    %101 = arith.extui %100 : vector<1x8x8xi1> to vector<1x8x8xi32>
    %102 = arith.sitofp %101 : vector<1x8x8xi32> to vector<1x8x8xf32>
    %103 = arith.mulf %97, %102 : vector<1x8x8xf32>
    %cst_21 = arith.constant dense<0.000000e+00> : vector<1x8xf32>
    %104 = vector.multi_reduction <add>, %103, %cst_21 [2] : vector<1x8x8xf32> to vector<1x8xf32>
    %105 = vector.shape_cast %104 : vector<1x8xf32> to vector<1x8x1xf32>
    %cst_22 = arith.constant dense<0.000000e+00> : vector<1x1xf32>
    %106 = vector.multi_reduction <add>, %105, %cst_22 [1] : vector<1x8x1xf32> to vector<1x1xf32>
    %107 = vector.shape_cast %106 : vector<1x1xf32> to vector<1x1x1xf32>
    %cst_23 = arith.constant 0.000000e+00 : f32
    %108 = vector.broadcast %cst_23 : f32 to vector<1x1x1xf32>
    %109 = arith.subf %108, %107 : vector<1x1x1xf32>
    %cst_24 = arith.constant 1.000000e+00 : f32
    %110 = vector.broadcast %cst_24 : f32 to vector<1x1x1xf32>
    %111 = arith.maximumf %76, %110 : vector<1x1x1xf32>
    %112 = arith.divf %109, %111 : vector<1x1x1xf32>
    %c0_25 = arith.constant 0 : index
    %c0_26 = arith.constant 0 : index
    %c0_27 = arith.constant 0 : index
    %113 = vector.load %arg4[%c0_25, %c0_26, %c0_27] : memref<1x1x1xf32, #tpu.memory_space<vmem>>, vector<1x1x1xf32>
    tpu.vector_store %arg4[%c0_25, %c0_26, %c0_27], %112 {strides = array<i32>} : memref<1x1x1xf32, #tpu.memory_space<vmem>>, vector<1x1x1xf32>,
    %cst_28 = arith.constant 0.000000e+00 : f32
    %114 = vector.broadcast %cst_28 : f32 to vector<1x1x1xf32>
    %115 = vector.extract_strided_slice %2 {offsets = [0, 0, 0], sizes = [1, 4, 1], strides = [1, 1, 1]} : vector<1x4x8xf32> to vector<1x4x1xf32>
    %116 = vector.broadcast %115 : vector<1x4x1xf32> to vector<1x4x16xf32>
    %117 = arith.mulf %54, %116 : vector<1x4x16xf32>
    %cst_29 = arith.constant dense<0.000000e+00> : vector<1x16xf32>
    %118 = vector.multi_reduction <add>, %117, %cst_29 [1] : vector<1x4x16xf32> to vector<1x16xf32>
    %119 = vector.shape_cast %118 : vector<1x16xf32> to vector<1x1x16xf32>
    %120 = vector.extract_strided_slice %1 {offsets = [0, 0, 0], sizes = [1, 1, 16], strides = [1, 1, 1]} : vector<1x4x16xf32> to vector<1x1x16xf32>
    %121 = arith.subf %120, %119 : vector<1x1x16xf32>
    %122 = math.absf %121 : vector<1x1x16xf32>
    %cst_30 = arith.constant 1.000000e+00 : f32
    %123 = vector.broadcast %cst_30 : f32 to vector<1x1x16xf32>
    %124 = arith.cmpf olt, %122, %123 : vector<1x1x16xf32>
    %cst_31 = arith.constant 5.000000e-01 : f32
    %125 = vector.broadcast %cst_31 : f32 to vector<1x1x16xf32>
    %126 = arith.mulf %125, %121 : vector<1x1x16xf32>
    %127 = arith.mulf %126, %121 : vector<1x1x16xf32>
    %cst_32 = arith.constant 5.000000e-01 : f32
    %128 = vector.broadcast %cst_32 : f32 to vector<1x1x16xf32>
    %129 = arith.subf %122, %128 : vector<1x1x16xf32>
    %130 = arith.select %124, %127, %129 : vector<1x1x16xi1>, vector<1x1x16xf32>
    %131 = arith.mulf %130, %74 : vector<1x1x16xf32>
    %cst_33 = arith.constant dense<0.000000e+00> : vector<1x1xf32>
    %132 = vector.multi_reduction <add>, %131, %cst_33 [2] : vector<1x1x16xf32> to vector<1x1xf32>
    %133 = vector.shape_cast %132 : vector<1x1xf32> to vector<1x1x1xf32>
    %134 = arith.addf %114, %133 : vector<1x1x1xf32>
    %135 = vector.extract_strided_slice %2 {offsets = [0, 0, 1], sizes = [1, 4, 1], strides = [1, 1, 1]} : vector<1x4x8xf32> to vector<1x4x1xf32>
    %136 = vector.broadcast %135 : vector<1x4x1xf32> to vector<1x4x16xf32>
    %137 = arith.mulf %54, %136 : vector<1x4x16xf32>
    %cst_34 = arith.constant dense<0.000000e+00> : vector<1x16xf32>
    %138 = vector.multi_reduction <add>, %137, %cst_34 [1] : vector<1x4x16xf32> to vector<1x16xf32>
    %139 = vector.shape_cast %138 : vector<1x16xf32> to vector<1x1x16xf32>
    %140 = vector.extract_strided_slice %1 {offsets = [0, 1, 0], sizes = [1, 1, 16], strides = [1, 1, 1]} : vector<1x4x16xf32> to vector<1x1x16xf32>
    %141 = arith.subf %140, %139 : vector<1x1x16xf32>
    %142 = math.absf %141 : vector<1x1x16xf32>
    %cst_35 = arith.constant 1.000000e+00 : f32
    %143 = vector.broadcast %cst_35 : f32 to vector<1x1x16xf32>
    %144 = arith.cmpf olt, %142, %143 : vector<1x1x16xf32>
    %cst_36 = arith.constant 5.000000e-01 : f32
    %145 = vector.broadcast %cst_36 : f32 to vector<1x1x16xf32>
    %146 = arith.mulf %145, %141 : vector<1x1x16xf32>
    %147 = arith.mulf %146, %141 : vector<1x1x16xf32>
    %cst_37 = arith.constant 5.000000e-01 : f32
    %148 = vector.broadcast %cst_37 : f32 to vector<1x1x16xf32>
    %149 = arith.subf %142, %148 : vector<1x1x16xf32>
    %150 = arith.select %144, %147, %149 : vector<1x1x16xi1>, vector<1x1x16xf32>
    %151 = arith.mulf %150, %74 : vector<1x1x16xf32>
    %cst_38 = arith.constant dense<0.000000e+00> : vector<1x1xf32>
    %152 = vector.multi_reduction <add>, %151, %cst_38 [2] : vector<1x1x16xf32> to vector<1x1xf32>
    %153 = vector.shape_cast %152 : vector<1x1xf32> to vector<1x1x1xf32>
    %154 = arith.addf %134, %153 : vector<1x1x1xf32>
    %155 = vector.extract_strided_slice %2 {offsets = [0, 0, 2], sizes = [1, 4, 1], strides = [1, 1, 1]} : vector<1x4x8xf32> to vector<1x4x1xf32>
    %156 = vector.broadcast %155 : vector<1x4x1xf32> to vector<1x4x16xf32>
    %157 = arith.mulf %54, %156 : vector<1x4x16xf32>
    %cst_39 = arith.constant dense<0.000000e+00> : vector<1x16xf32>
    %158 = vector.multi_reduction <add>, %157, %cst_39 [1] : vector<1x4x16xf32> to vector<1x16xf32>
    %159 = vector.shape_cast %158 : vector<1x16xf32> to vector<1x1x16xf32>
    %160 = vector.extract_strided_slice %1 {offsets = [0, 2, 0], sizes = [1, 1, 16], strides = [1, 1, 1]} : vector<1x4x16xf32> to vector<1x1x16xf32>
    %161 = arith.subf %160, %159 : vector<1x1x16xf32>
    %162 = math.absf %161 : vector<1x1x16xf32>
    %cst_40 = arith.constant 1.000000e+00 : f32
    %163 = vector.broadcast %cst_40 : f32 to vector<1x1x16xf32>
    %164 = arith.cmpf olt, %162, %163 : vector<1x1x16xf32>
    %cst_41 = arith.constant 5.000000e-01 : f32
    %165 = vector.broadcast %cst_41 : f32 to vector<1x1x16xf32>
    %166 = arith.mulf %165, %161 : vector<1x1x16xf32>
    %167 = arith.mulf %166, %161 : vector<1x1x16xf32>
    %cst_42 = arith.constant 5.000000e-01 : f32
    %168 = vector.broadcast %cst_42 : f32 to vector<1x1x16xf32>
    %169 = arith.subf %162, %168 : vector<1x1x16xf32>
    %170 = arith.select %164, %167, %169 : vector<1x1x16xi1>, vector<1x1x16xf32>
    %171 = arith.mulf %170, %74 : vector<1x1x16xf32>
    %cst_43 = arith.constant dense<0.000000e+00> : vector<1x1xf32>
    %172 = vector.multi_reduction <add>, %171, %cst_43 [2] : vector<1x1x16xf32> to vector<1x1xf32>
    %173 = vector.shape_cast %172 : vector<1x1xf32> to vector<1x1x1xf32>
    %174 = arith.addf %154, %173 : vector<1x1x1xf32>
    %175 = vector.extract_strided_slice %2 {offsets = [0, 0, 3], sizes = [1, 4, 1], strides = [1, 1, 1]} : vector<1x4x8xf32> to vector<1x4x1xf32>
    %176 = vector.broadcast %175 : vector<1x4x1xf32> to vector<1x4x16xf32>
    %177 = arith.mulf %54, %176 : vector<1x4x16xf32>
    %cst_44 = arith.constant dense<0.000000e+00> : vector<1x16xf32>
    %178 = vector.multi_reduction <add>, %177, %cst_44 [1] : vector<1x4x16xf32> to vector<1x16xf32>
    %179 = vector.shape_cast %178 : vector<1x16xf32> to vector<1x1x16xf32>
    %180 = vector.extract_strided_slice %1 {offsets = [0, 3, 0], sizes = [1, 1, 16], strides = [1, 1, 1]} : vector<1x4x16xf32> to vector<1x1x16xf32>
    %181 = arith.subf %180, %179 : vector<1x1x16xf32>
    %182 = math.absf %181 : vector<1x1x16xf32>
    %cst_45 = arith.constant 1.000000e+00 : f32
    %183 = vector.broadcast %cst_45 : f32 to vector<1x1x16xf32>
    %184 = arith.cmpf olt, %182, %183 : vector<1x1x16xf32>
    %cst_46 = arith.constant 5.000000e-01 : f32
    %185 = vector.broadcast %cst_46 : f32 to vector<1x1x16xf32>
    %186 = arith.mulf %185, %181 : vector<1x1x16xf32>
    %187 = arith.mulf %186, %181 : vector<1x1x16xf32>
    %cst_47 = arith.constant 5.000000e-01 : f32
    %188 = vector.broadcast %cst_47 : f32 to vector<1x1x16xf32>
    %189 = arith.subf %182, %188 : vector<1x1x16xf32>
    %190 = arith.select %184, %187, %189 : vector<1x1x16xi1>, vector<1x1x16xf32>
    %191 = arith.mulf %190, %74 : vector<1x1x16xf32>
    %cst_48 = arith.constant dense<0.000000e+00> : vector<1x1xf32>
    %192 = vector.multi_reduction <add>, %191, %cst_48 [2] : vector<1x1x16xf32> to vector<1x1xf32>
    %193 = vector.shape_cast %192 : vector<1x1xf32> to vector<1x1x1xf32>
    %194 = arith.addf %174, %193 : vector<1x1x1xf32>
    %cst_49 = arith.constant 1.000000e+00 : f32
    %195 = vector.broadcast %cst_49 : f32 to vector<1x1x1xf32>
    %196 = arith.maximumf %78, %195 : vector<1x1x1xf32>
    %cst_50 = arith.constant 4.000000e+00 : f32
    %197 = vector.broadcast %cst_50 : f32 to vector<1x1x1xf32>
    %198 = arith.mulf %196, %197 : vector<1x1x1xf32>
    %199 = arith.divf %194, %198 : vector<1x1x1xf32>
    %c0_51 = arith.constant 0 : index
    %c0_52 = arith.constant 0 : index
    %c0_53 = arith.constant 0 : index
    %200 = vector.load %arg5[%c0_51, %c0_52, %c0_53] : memref<1x1x1xf32, #tpu.memory_space<vmem>>, vector<1x1x1xf32>
    tpu.vector_store %arg5[%c0_51, %c0_52, %c0_53], %199 {strides = array<i32>} : memref<1x1x1xf32, #tpu.memory_space<vmem>>, vector<1x1x1xf32>,
    return
  }
  func.func @transform_0(%arg0: i32) -> (i32, i32, i32) {
    %c0_i32 = arith.constant 0 : i32
    %c0_i32_0 = arith.constant 0 : i32
    %c0_i32_1 = arith.constant 0 : i32
    return %arg0, %c0_i32, %c0_i32_0 : i32, i32, i32
  }
  func.func @transform_1(%arg0: i32) -> (i32, i32, i32) {
    %c0_i32 = arith.constant 0 : i32
    %c0_i32_0 = arith.constant 0 : i32
    %c0_i32_1 = arith.constant 0 : i32
    return %arg0, %c0_i32, %c0_i32_0 : i32, i32, i32
  }
  func.func @transform_2(%arg0: i32) -> (i32, i32, i32) {
    %c0_i32 = arith.constant 0 : i32
    %c0_i32_0 = arith.constant 0 : i32
    %c0_i32_1 = arith.constant 0 : i32
    return %arg0, %c0_i32, %c0_i32_0 : i32, i32, i32
  }
  func.func @transform_3(%arg0: i32) -> (i32, i32, i32) {
    %c0_i32 = arith.constant 0 : i32
    %c0_i32_0 = arith.constant 0 : i32
    %c0_i32_1 = arith.constant 0 : i32
    return %arg0, %c0_i32, %c0_i32_0 : i32, i32, i32
  }
  func.func @transform_4(%arg0: i32) -> (i32, i32, i32) {
    %c0_i32 = arith.constant 0 : i32
    %c0_i32_0 = arith.constant 0 : i32
    %c0_i32_1 = arith.constant 0 : i32
    return %arg0, %c0_i32, %c0_i32_0 : i32, i32, i32
  }
}

</mosaic_0001>

<bundles_post_ra>
// kernel: tpu_custom_call.1
= control target key start
LH: loop header
LB: loop body
LE: loop exit
PB: predicated region body
PF: predicated region fallthrough
CT: control target
= control target key end

     0   :  { %s801_s15 = smov 0   ;;  %s937_s0 = inlined_call_operand.vmem [shape: f32[2,16,8], index: 0, kind: input, shape index: {}]   ;;  %s938_s1 = inlined_call_operand.vmem [shape: f32[2,4,16], index: 1, kind: input, shape index: {}]   ;;  %s939_s2 = inlined_call_operand.vmem [shape: f32[2,4,8], index: 2, kind: input, shape index: {}]   ;;  %s940_s3 = inlined_call_operand.vmem [shape: f32[2,1,1], index: 3, kind: output, shape index: {0}]   ;;  %s941_s4 = inlined_call_operand.vmem [shape: f32[2,1,1], index: 4, kind: output, shape index: {1}]  }
   0x1 LB: > { %s684_s16 = sadd.s32 4294967295, %s764_s15   ;;  %p688_p0 = scmp.ge.s32.totalorder %s764_s15, 1  ;;  %s764_s15 = sphi %s801_s15, %s15_s15  }
   0x2   : > { %p183_p1 = scmp.lt.s32.totalorder %s764_s15, 3 }
   0x4   : > { %p184_p2 = pnand %p688_p0, %p183_p1 }
   0x5   : > { %p218_p3 = scmp.lt.s32.totalorder (!%p184_p2), %s684_s16, 1  ;;  %v766_v0 = vmov (!%p184_p2), 2   ;;  %vm367_vm0 = vcmask (!%p184_p2), 64512   ;;  %s767_s25 = smov (!%p184_p2), 2   ;;  %v768_v6 = vmov (!%p184_p2), 0   ;;  %v770_v9 = vmov (!%p184_p2), 3  }
   0x6   : > { %187 = sbr.rel (%p184_p2) target bundleno = 828 (0x33c), region = 32  ;;  %738 = vset.pattern.permute.xlu0 (!%p184_p2), %v766_v0  ;;  %739 = vset.pattern.permute.xlu1 (!%p184_p2), %v768_v6  ;;  %s769_s26 = smov (!%p184_p2), 127   ;;  %v771_v10 = vmov (!%p184_p2), 1   ;;  %v772_v12 = vmov (!%p184_p2), 4   ;;  %v773_v24 = vmov (!%p184_p2), 0.0|0.0   ;;  %vm774_vm1 = vmmov (!%p184_p2), 0  }
   0x7   : > { %715 = vmatprep.subr.bf16.mxu0 (!%p184_p2), %v773_v24  ;;  %v775_v25 = vmov (!%p184_p2), 0.0   ;;  %v259_v26 = vlaneseq (!%p184_p2)  ;;  %vm313_vm2 = vcmask (!%p184_p2), 125952   ;;  %vm360_vm3 = vcmask (!%p184_p2), 130048  }
   0x8   : > { %712 = vmatprep.mubr.msk.f32.mxu0 (!%p184_p2), %vm774_vm1, %v775_v25  ;;  %vm527_vm1 = vcmask (!%p184_p2), 123905  }
   0x9   : > { %v841_v27 = vshrl.u32 (!%p184_p2), %v259_v26, 7 }
   0xb   : > { %v270_v30 = vsub.s32 (!%p184_p2), 0, %v841_v27  ;;  %v261_v31 = vsub.s32 (!%p184_p2), 2, %v841_v27  ;;  %v281_v32 = vsub.s32 (!%p184_p2), 3, %v841_v27  ;;  %v290_v33 = vsub.s32 (!%p184_p2), 1, %v841_v27 }
   0xd   : > { %s949_s16 = smov (!%p218_p3, %s684_s16), 1 }
   0xe   : > { %s691_s17 = sshll.u32 %s949_s16, 2  ;;  %s704_s18 = sshll.u32 %s949_s16, 4 }
   0xf   : > { %s230_s21 = scalar_lea.vmem %s939_s2, %s691_s17  ;;  %s222_s24 = scalar_lea.vmem %s937_s0, %s704_s18 }
  0x10   : > { %v240_v1 = vld [vmem:[%s230_s21] sm:$0xf]  ;;  %v823_v3 = vld [vmem:[%s222_s24 + $0x8] sm:$0xff]  ;;  %s226_s29 = scalar_lea.vmem %s938_s1, %s691_s17  ;;  %s233_s6 = scalar_lea.vmem %s940_s3, %s949_s16 }
  0x11   : > { %250 = vrot.lane.b32.xlu0 %v240_v1, %s767_s25  ;;  %v821_v2 = vld [vmem:[%s222_s24] sm:$0xff]  ;;  %v371_v5 = vsel %vm367_vm0, %v823_v3, -inf  ;;  %s236_s9 = scalar_lea.vmem %s941_s4, %s949_s16 }
  0x12   : > { %v368_v4 = vsel %vm367_vm0, %v821_v2, -inf  ;;  %v850_v29 = vld [vmem:[%s226_s29] sm:$0xf] }
  0x13   : > { %369 = vmax.xlane.f32.xlu1 %v368_v4  ;;  %v242_v34 = vrot.slane %v850_v29, 6  ;;  %v271_v36 = vrot.slane %v850_v29, %v270_v30  ;;  %v262_v37 = vrot.slane %v850_v29, %v261_v31  ;;  %v282_v38 = vrot.slane %v850_v29, %v281_v32 }
  0x14   : > { %v291_v39 = vrot.slane %v850_v29, %v290_v33 }
  0x15   : > { %v244_v41 = vsub.f32 %v850_v29, %v242_v34 }
  0x17   : > { %372 = vmax.xlane.f32.xlu1 %v371_v5  ;;  %v246_v47 = vrot.slane %v244_v41, 1 }
  0x19   : > { %v248_v50 = vmul.f32 %v246_v47, %v244_v41 }
  0x1b   : > { %v303_v53 = vrot.slane %v248_v50, %v261_v31 }
  0x28   : > { %273 = vperm.xlu1 %739, %v240_v1  }
  0x2c   : > { %742 = vset.pattern.permute.xlu1 %v766_v0 }
  0x83   : > { %v251_v7 = vpop.permute.xlu0 %250 }
  0x84   : > { %v253_v8 = vsub.f32 %v240_v1, %v251_v7 }
  0x86   : > { %255 = vrot.lane.b32.xlu0 %v253_v8, %s769_s26 }
  0x8a   : > { %264 = vperm.xlu0 %738, %v240_v1  }
  0x8e   : > { %740 = vset.pattern.permute.xlu0 %v770_v9 }
  0x8f   : > { %284 = vperm.xlu0 %740, %v240_v1  }
  0x93   : > { %741 = vset.pattern.permute.xlu0 %v771_v10 }
  0x94   : > { %293 = vperm.xlu0 %741, %v240_v1  }
  0x98   : > { %743 = vset.pattern.permute.xlu0 %v772_v12 }
  0xa0   : > { %v829_v11 = vpop.xlane.xlu1 %369 }
  0xa1   : > { %v374_v20 = vsub.f32 %v821_v2, %v829_v11 }
  0xa3   : > { %v376_v21 = vmul.f32 1.442695, %v374_v20 }
  0xa4   : > { %v831_v13 = vpop.xlane.xlu1 %372 }
  0xa5   : > { %v375_v14 = vsub.f32 %v823_v3, %v831_v13 }
  0xa7   : > { %v378_v15 = vmul.f32 1.442695, %v375_v14 }
  0xa8   : > { %v274_v40 = vpop.permute.xlu1 %273 }
  0xa9   : > { %744 = vpow2.f32 %v378_v15  ;;  %v276_v43 = vmax.f32 %v271_v36, %v274_v40 }
  0xaa   : > { %746 = vpow2.f32 %v376_v21 }
  0xb3   : > { %v745_v16 = vpop.eup %744 }
  0xb4   : > { %v383_v17 = vsel %vm367_vm0, %v745_v16, 0.0  ;;  %v747_v22 = vpop.eup %746 }
  0xb5   : > { %384 = vadd.xlane.f32.xlu0 %v383_v17  ;;  %v380_v23 = vsel %vm367_vm0, %v747_v22, 0.0 }
  0xcb   : > { %339 = vperm.xlu0 %743, %v240_v1  }
  0xf8   : > { %v256_v18 = vpop.permute.xlu0 %255 }
  0xf9   : > { %v258_v19 = vmul.f32 %v256_v18, %v253_v8 }
  0xfb   : > { %306 = vperm.xlu1 %742, %v258_v19  }
 0x109   : > { %v843_v28 = vpop.permute.xlu0 %264 }
 0x10a   : > { %v267_v44 = vmin.f32 %v262_v37, %v843_v28 }
 0x10c   : > { %v277_v49 = vsub.f32 %v267_v44, %v276_v43 }
 0x10e   : > { %v285_v35 = vpop.permute.xlu0 %284  ;;  %v278_v52 = vmax.f32 %v277_v49, 0.0 }
 0x10f   : > { %v287_v45 = vmin.f32 %v282_v38, %v285_v35 }
 0x113   : > { %v294_v42 = vpop.permute.xlu0 %293 }
 0x114   : > { %v296_v46 = vmax.f32 %v291_v39, %v294_v42 }
 0x116   : > { %v297_v48 = vsub.f32 %v287_v45, %v296_v46 }
 0x118   : > { %v298_v51 = vmax.f32 %v297_v48, 0.0 }
 0x11a   : > { %v299_v55 = vmul.f32 %v298_v51, %v278_v52 }
 0x11f   : > { %381 = vadd.xlane.f32.xlu1 %v380_v23 }
 0x142   : > { %v385_v14 = vpop.xlane.xlu0 %384 }
 0x14a   : > { %v340_v17 = vpop.permute.xlu0 %339 }
 0x17a   : > { %v307_v54 = vpop.permute.xlu1 %306 }
 0x17b   : > { %v309_v56 = vadd.f32 %v307_v54, %v303_v53 }
 0x17d   : > { %v310_v57 = vsub.f32 %v309_v56, %v299_v55 }
 0x17f   : > { %748 = vrcp.f32 %v310_v57 }
 0x180   : > { %750 = vlog2.f32 %v385_v14 }
 0x189   : > { %v749_v58 = vpop.eup %748 }
 0x18a   : > { %v312_v59 = vmul.f32 %v749_v58, %v299_v55 }
 0x18c   : > { %v314_v60 = vsel %vm313_vm2, %v312_v59, -inf }
 0x18d   : > { %v315_v61 = vrot.slane %v314_v60, 4 }
 0x18f   : > { %v316_v62 = vmax.f32 %v314_v60, %v315_v61 }
 0x191   : > { %v317_v63 = vrot.slane %v316_v62, 2 }
 0x193   : > { %v318_v0 = vmax.f32 %v316_v62, %v317_v63 }
 0x195   : > { %v319_v1 = vrot.slane %v318_v0, 1 }
 0x197   : > { %v864_v4 = vmax.f32 %v318_v0, %v319_v1 }
 0x199   : > { %vm323_vm4 = vcmp.ge.f32.partialorder %v312_v59, %v864_v4  ;;  %vm351_vm5 = vcmp.ge.f32.partialorder %v864_v4, 0.3  ;;  %vm352_vm10 = vcmp.lt.f32.partialorder %v864_v4, 0.1 }
 0x19a   : > { %v324_v5 = vsel %vm323_vm4, %v841_v27, 4  ;;  %v872_v6 = vsel %vm351_vm5, 1.0, %v775_v25 }
 0x19b   : > { %v325_v7 = vsel %vm313_vm2, %v324_v5, 2147483647  ;;  %v364_v8 = vsel %vm360_vm3, %v872_v6, 0.0 }
 0x19c   : > { %v326_v9 = vrot.slane %v325_v7, 4  ;;  %365 = vadd.xlane.f32.xlu1 %v364_v8 }
 0x19e   : > { %vm327_vm6 = vcmp.lt.s32.totalorder %v325_v7, %v326_v9 }
 0x19f   : > { %v328_v10 = vsel %vm327_vm6, %v325_v7, %v326_v9  ;;  %vm575_vm6 = vcmask 125955  }
 0x1a0   : > { %v329_v12 = vrot.slane %v328_v10, 2 }
 0x1a2   : > { %vm330_vm7 = vcmp.lt.s32.totalorder %v328_v10, %v329_v12 }
 0x1a3   : > { %v331_v15 = vsel %vm330_vm7, %v328_v10, %v329_v12 }
 0x1a4   : > { %v332_v16 = vrot.slane %v331_v15, 1 }
 0x1a6   : > { %vm333_vm8 = vcmp.lt.s32.totalorder %v331_v15, %v332_v16 }
 0x1a7   : > { %v334_v18 = vsel %vm333_vm8, %v331_v15, %v332_v16 }
 0x1a8   : > { %vm335_vm9 = vcmp.eq.s32.totalorder %v841_v27, %v334_v18 }
 0x1a9   : > { %v693_v19 = vsel %vm335_vm9, 1.0, %v775_v25 }
 0x1aa   : > { %v342_v20 = vmul.f32 %v693_v19, %v340_v17  ;;  %v490_v21 = vmul.f32 %v693_v19, %v274_v40  ;;  %v511_v22 = vmul.f32 %v693_v19, %v294_v42  ;;  %v535_v23 = vmul.f32 %v693_v19, %v843_v28  ;;  %v751_v40 = vpop.eup %750 }
 0x1ab   : > { %v559_v24 = vmul.f32 %v693_v19, %v285_v35  ;;  %v389_v49 = vmul.f32 0.6931472, %v751_v40 }
 0x1ac   : > { %v343_v30 = vsel %vm313_vm2, %v342_v20, 0.0  ;;  %v491_v31 = vsel %vm313_vm2, %v490_v21, 0.0  ;;  %v512_v32 = vsel %vm313_vm2, %v511_v22, 0.0  ;;  %v536_v33 = vsel %vm313_vm2, %v535_v23, 0.0  ;;  %v382_v34 = vpop.xlane.xlu1 %381 }
 0x1ad   : > { %v344_v36 = vrot.slane %v343_v30, 4  ;;  %v492_v37 = vrot.slane %v491_v31, 4  ;;  %v513_v38 = vrot.slane %v512_v32, 4  ;;  %v537_v39 = vrot.slane %v536_v33, 4 }
 0x1ae   : > { %v560_v41 = vsel %vm313_vm2, %v559_v24, 0.0  ;;  %752 = vlog2.f32 %v382_v34  ;;  %v391_v60 = vadd.f32 %v389_v49, %v831_v13 }
 0x1af   : > { %v345_v42 = vadd.f32 %v344_v36, %v343_v30  ;;  %v493_v28 = vadd.f32 %v492_v37, %v491_v31  ;;  %v514_v35 = vadd.f32 %v513_v38, %v512_v32  ;;  %v538_v43 = vadd.f32 %v537_v39, %v536_v33 }
 0x1b0   : > { %v561_v44 = vrot.slane %v560_v41, 4  ;;  %v393_v14 = vsub.f32 %v823_v3, %v391_v60 }
 0x1b1   : > { %v346_v45 = vrot.slane %v345_v42, 2  ;;  %v494_v46 = vrot.slane %v493_v28, 2  ;;  %v515_v47 = vrot.slane %v514_v35, 2  ;;  %v539_v48 = vrot.slane %v538_v43, 2 }
 0x1b2   : > { %v562_v50 = vadd.f32 %v561_v44, %v560_v41 }
 0x1b3   : > { %v347_v51 = vadd.f32 %v346_v45, %v345_v42  ;;  %v516_v52 = vadd.f32 %v515_v47, %v514_v35  ;;  %v495_v53 = vadd.f32 %v494_v46, %v493_v28  ;;  %v540_v54 = vadd.f32 %v539_v48, %v538_v43 }
 0x1b4   : > { %v563_v55 = vrot.slane %v562_v50, 2 }
 0x1b5   : > { %v348_v56 = vrot.slane %v347_v51, 1  ;;  %v517_v57 = vrot.slane %v516_v52, 1  ;;  %v496_v58 = vrot.slane %v495_v53, 1  ;;  %v541_v59 = vrot.slane %v540_v54, 1 }
 0x1b6   : > { %v564_v61 = vadd.f32 %v563_v55, %v562_v50 }
 0x1b7   : > { %v349_v62 = vadd.f32 %v348_v56, %v347_v51  ;;  %v518_v63 = vadd.f32 %v517_v57, %v516_v52  ;;  %v497_v0 = vadd.f32 %v496_v58, %v495_v53  ;;  %v542_v1 = vadd.f32 %v541_v59, %v540_v54 }
 0x1b8   : > { %v753_v5 = vpop.eup %752  ;;  %v565_v7 = vrot.slane %v564_v61, 1  ;;  %v470_v54 = vand.u32 127, %v259_v26 }
 0x1b9   : > { %v387_v8 = vmul.f32 0.6931472, %v753_v5  ;;  %v718_v9 = vtrunc.f32 %v349_v62  ;;  %v519_v10 = vsub.f32 %v850_v29, %v518_v63  ;;  %v498_v12 = vsub.f32 %v850_v29, %v497_v0 }
 0x1ba   : > { %v543_v15 = vsub.f32 %v850_v29, %v542_v1  ;;  %v566_v13 = vadd.f32 %v565_v7, %v564_v61  ;;  %vm471_vm4 = vcmp.eq.s32.totalorder %v841_v27, %v470_v54 }
 0x1bb   : > { %v390_v16 = vadd.f32 %v387_v8, %v829_v11  ;;  %v719_v17 = vcvt.f32.s32 %v718_v9  ;;  %v520_v18 = vand.u32 2147483647, %v519_v10  ;;  %v522_v19 = vmul.f32 0.5, %v519_v10 }
 0x1bc   : > { %v499_v20 = vand.u32 2147483647, %v498_v12  ;;  %v501_v21 = vmul.f32 0.5, %v498_v12  ;;  %v544_v22 = vand.u32 2147483647, %v543_v15  ;;  %v546_v23 = vmul.f32 0.5, %v543_v15 }
 0x1bd   : > { %v392_v24 = vsub.f32 %v821_v2, %v390_v16  ;;  %v353_v30 = vsel %vm351_vm5, %v719_v17, 4294967295  ;;  %vm895_vm11 = vcmp.lt.f32.partialorder %v520_v18, 1.0  ;;  %v523_v31 = vmul.f32 %v522_v19, %v519_v10 }
 0x1be   : > { %v354_v32 = vsel %vm352_vm10, 0, %v353_v30  ;;  %v699_v33 = vadd.f32 -0.5, %v520_v18  ;;  %vm899_vm12 = vcmp.lt.f32.partialorder %v499_v20, 1.0  ;;  %v502_v34 = vmul.f32 %v501_v21, %v498_v12 }
 0x1bf   : > { %v716_v36 = vpack.c.bf16 %v393_v14, %v392_v24  ;;  %vm355_vm13 = vcmp.ne.s32.totalorder %v354_v32, 4294967295  ;;  %vm394_vm14 = vcmp.eq.s32.totalorder %v841_v27, %v354_v32  ;;  %v698_v2 = vadd.f32 -0.5, %v499_v20 }
 0x1c0   : > { %v694_v4 = vsel %vm355_vm13, 1.0, %v775_v25  ;;  %v525_v37 = vsel %vm895_vm11, %v523_v31, %v699_v33  ;;  %vm907_vm15 = vcmp.lt.f32.partialorder %v544_v22, 1.0  ;;  %v547_v39 = vmul.f32 %v546_v23, %v543_v15 }
 0x1c1   : > { %717 = vmatpush3.bf16.msra.mxu0 %v716_v36  ;;  %v361_v41 = vsel %vm360_vm3, %v694_v4, 0.0  ;;  %v395_v40 = vsel %vm394_vm14, %v694_v4, 0.0  ;;  %v526_v42 = vmul.f32 %v872_v6, %v525_v37  ;;  %v504_v28 = vsel %vm899_vm12, %v502_v34, %v698_v2 }
 0x1c2   : > { %362 = vadd.xlane.f32.xlu1 %v361_v41  ;;  %v505_v35 = vmul.f32 %v872_v6, %v504_v28  ;;  %v700_v43 = vadd.f32 -0.5, %v544_v22  ;;  %v567_v44 = vsub.f32 %v850_v29, %v566_v13  ;;  %v697_v29 = vsel %vm471_vm4, 1.0, %v775_v25 }
 0x1c3   : > { %v528_v48 = vsel %vm527_vm1, %v526_v42, 0.0  ;;  %vm551_vm5 = vcmask 124930  }
 0x1c4   : > { %713 = vmatmul.mubr.msk.f32.vlgmr.msra.gmra.mrb[0].mxu0 %vm360_vm3, %v395_v40  ;;  %v549_v45 = vsel %vm907_vm15, %v547_v39, %v700_v43  ;;  %v568_v46 = vand.u32 2147483647, %v567_v44  ;;  %v570_v47 = vmul.f32 0.5, %v567_v44  ;;  %vm506_vm3 = vcmask 122880  }
 0x1c5   : > { %v550_v49 = vmul.f32 %v872_v6, %v549_v45  ;;  %v507_v59 = vsel %vm506_vm3, %v505_v35, 0.0 }
 0x1c6   : > { %529 = vadd.xlane.f32.xlu1 %v528_v48  ;;  %vm569_vm2 = vcmp.lt.f32.partialorder %v568_v46, 1.0  ;;  %v571_v50 = vmul.f32 %v570_v47, %v567_v44  ;;  %v701_v51 = vadd.f32 -0.5, %v568_v46 }
 0x1c7   : > { %v552_v60 = vsel %vm551_vm5, %v550_v49, 0.0 }
 0x1c8   : > { %v573_v52 = vsel %vm569_vm2, %v571_v50, %v701_v51 }
 0x1c9   : > { %v574_v53 = vmul.f32 %v872_v6, %v573_v52 }
 0x1cb   : > { %v576_v6 = vsel %vm575_vm6, %v574_v53, 0.0 }
 0x229   : > { %v366_v26 = vpop.xlane.xlu1 %365 }
 0x22a   : > { %v583_v62 = vmax.f32 %v366_v26, 1.0 }
 0x22c   : > { %v584_v1 = vmul.f32 4.0, %v583_v62 }
 0x24f   : > { %v363_v61 = vpop.xlane.xlu1 %362 }
 0x250   : > { %v485_v25 = vmax.f32 %v363_v61, 1.0 }
 0x252   : > { %754 = vrcp.f32 %v485_v25 }
 0x253   : > { %v530_v27 = vpop.xlane.xlu1 %529  ;;  %756 = vrcp.f32 %v584_v1 }
 0x254   : > { %v532_v12 = vrot.slane %v530_v27, 1 }
 0x25c   : > { %v755_v21 = vpop.eup %754 }
 0x25d   : > { %v757_v24 = vpop.eup %756 }
 0x297   : > { %v465_v55 = vpop.f32.mrb[0].mxu0 }
 0x298   : > { %v474_v56 = vmul.f32 %v697_v29, %v465_v55  ;;  %v714_v57 = vpop.f32.mrb[1].mxu0 }
 0x29a   : > { %v475_v58 = vsel %vm367_vm0, %v474_v56, 0.0  ;;  %vm488_vm0 = vcmask 0  }
 0x29b   : > { %476 = vadd.xlane.f32.xlu1 %v475_v58 }
 0x29f   : > { %508 = vadd.xlane.f32.xlu1 %v507_v59 }
 0x2a3   : > { %553 = vadd.xlane.f32.xlu1 %v552_v60 }
 0x2a7   : > { %577 = vadd.xlane.f32.xlu1 %v576_v6 }
 0x328   : > { %v477_v63 = vpop.xlane.xlu1 %476 }
 0x329   : > { %v478_v0 = vrot.slane %v477_v63, 4 }
 0x32b   : > { %v479_v5 = vadd.f32 %v478_v0, %v477_v63 }
 0x32c   : > { %v509_v7 = vpop.xlane.xlu1 %508 }
 0x32d   : > { %v480_v8 = vrot.slane %v479_v5, 2  ;;  %v534_v16 = vadd.f32 %v532_v12, %v509_v7 }
 0x32f   : > { %v481_v9 = vadd.f32 %v480_v8, %v479_v5 }
 0x330   : > { %v554_v10 = vpop.xlane.xlu1 %553 }
 0x331   : > { %v482_v14 = vrot.slane %v481_v9, 1  ;;  %v556_v15 = vrot.slane %v554_v10, 2 }
 0x333   : > { %v483_v13 = vadd.f32 %v482_v14, %v481_v9  ;;  %v558_v19 = vadd.f32 %v556_v15, %v534_v16 }
 0x334   : > { %v578_v17 = vpop.xlane.xlu1 %577 }
 0x335   : > { %v484_v18 = vsub.f32 0.0, %v483_v13  ;;  %v580_v20 = vrot.slane %v578_v17, 3 }
 0x337   : > { %v487_v22 = vmul.f32 %v755_v21, %v484_v18  ;;  %v582_v23 = vadd.f32 %v580_v20, %v558_v19 }
 0x339   : > { %489 = vst.msk [vmem:[%s233_s6] sm:$0x1] %vm488_vm0, %v487_v22  ;;  %v586_v30 = vmul.f32 %v757_v24, %v582_v23 }
 0x33b   : > { %587 = vst.msk [vmem:[%s236_s9] sm:$0x1] %vm488_vm0, %v586_v30 }
 0x33c PF: > { %s15_s15 = sadd.s32 1, %s764_s15  }
 0x33d   : > { %p12_p4 = scmp.ge.s32.totalorder %s15_s15, 4  }
 0x33f   :  { %14 = sbr.rel (!%p12_p4) target bundleno = 1 (0x1), region = 80 }

</bundles_post_ra>
